<compile_context>
chip_gen: v5e
topology: v5e:2x2
jax: 0.10.0
libtpu: 0.0.40
codegen_flags: <defaults>
</compile_context>

<pallas_src>
import math

import jax
import jax.numpy as jnp
from jax import lax
from jax.experimental import pallas as pl
from jax.experimental.pallas import tpu as pltpu

BN_EPS = 1e-5
LEAKY_SLOPE = 0.01


# ----------------------------------------------------------------------------
# phase decomposition helper (pure Python, static shapes)
# ----------------------------------------------------------------------------
def _phase_taps(k, s, p):
    """For each output phase r in [0, s): list of (kernel tap kk, input offset e)
    such that output position s*q + r receives x[q + e] * w[kk]."""
    taps = []
    for r in range(s):
        tr = []
        for kk in range(k):
            t = r + p - kk
            if t % s == 0:
                tr.append((kk, t // s))   # exact division (remainder checked)
        taps.append(tr)
    return taps


# ----------------------------------------------------------------------------
# fused Pallas kernel: conv matmul + batch stats + BN affine + LeakyReLU
# ----------------------------------------------------------------------------
def _fused_decoder_kernel(x_ref, w_ref, g_ref, b_ref, o_ref):
    # x_ref: (N, Kp, HW)     bf16  block-sparse-K im2col, columns in (Ho,Wo) order
    # w_ref: (Co_pb, Kp)     bf16  row-padded per-channel-block weight matrix
    # g_ref: (Co_blk, 1)     f32   BatchNorm gamma
    # b_ref: (Co_blk, 1)     f32   BatchNorm beta
    # o_ref: (N, Co_blk, HW) f32   final activations (NCHW once reshaped)
    n_batch, co_blk, hw = o_ref.shape
    w = w_ref[...]

    # ---- conv: one MXU matmul per batch, conv result stays resident --------
    # NOTE: with tiny Ci/Co this still under-fills the MXU; a VPU broadcast-FMA
    # over the Kp taps would be the micro-opt if channels stay this small.
    ys = []
    s1 = jnp.zeros((co_blk, 1), jnp.float32)
    for n in range(n_batch):                       # static unroll, N is small
        y = jnp.dot(w, x_ref[n], preferred_element_type=jnp.float32)  # (Co_pb, HW)
        y = y[:co_blk]                             # drop zero row padding
        ys.append(y)
        s1 = s1 + jnp.sum(y, axis=1, keepdims=True)

    # ---- training-mode BatchNorm stats (two-pass, centered variance) -------
    inv_cnt = 1.0 / float(n_batch * hw)
    mean = s1 * inv_cnt
    s2 = jnp.zeros((co_blk, 1), jnp.float32)
    for y in ys:
        d = y - mean
        s2 = s2 + jnp.sum(d * d, axis=1, keepdims=True)
    var = s2 * inv_cnt                             # biased batch variance

    # ---- folded affine + LeakyReLU, lane-dense stores -----------------------
    scale = g_ref[...] * lax.rsqrt(var + BN_EPS)
    shift = b_ref[...] - mean * scale
    for n in range(n_batch):
        z = ys[n] * scale + shift
        o_ref[n] = jnp.maximum(z, LEAKY_SLOPE * z)


# ----------------------------------------------------------------------------
# public wrapper (PyTorch NCHW convention at the boundary)
# ----------------------------------------------------------------------------
def decoder_forward(x_nchw, weight, bias, gamma, beta,
                    stride, padding, output_padding):
    """x_nchw: (N, Ci, H, W); weight: (Ci, Co, kH, kW) (nn.ConvTranspose2d layout)."""
    N, Ci, H, W = x_nchw.shape
    ci_w, Co, kH, kW = weight.shape
    assert ci_w == Ci
    sH, sW = stride
    pH, pW = padding
    opH, opW = output_padding

    Ho = (H - 1) * sH - 2 * pH + kH + opH
    Wo = (W - 1) * sW - 2 * pW + kW + opW
    HW = Ho * Wo

    taps_h = _phase_taps(kH, sH, pH)
    taps_w = _phase_taps(kW, sW, pW)

    # Zero-extended input so every per-tap read is a plain in-bounds slice
    # (handles both negative offsets and reads past the last input row/col).
    eh_all = [e for tr in taps_h for (_, e) in tr] or [0]
    ew_all = [e for tr in taps_w for (_, e) in tr] or [0]
    off_h = max(0, -min(eh_all))
    off_w = max(0, -min(ew_all))
    Hq = pl.cdiv(Ho, sH)
    Wq = pl.cdiv(Wo, sW)
    H_ext = off_h + max(H, Hq + max(eh_all))
    W_ext = off_w + max(W, Wq + max(ew_all))
    x_ext = jnp.zeros((N, Ci, H_ext, W_ext), jnp.float32)
    x_ext = x_ext.at[:, :, off_h:off_h + H, off_w:off_w + W].set(
        x_nchw.astype(jnp.float32))

    # ---- block-sparse-K im2col with output-interleaved columns --------------
    # For each phase (rh, rw) and each of its kernel taps we take the matching
    # input window and scatter it (via an interior-dilated pad) onto its final
    # interleaved output positions (rh::sH, rw::sW).  Concatenating tap blocks
    # along K gives columns that are already in row-major (Ho, Wo) order, so
    # the matmul output needs no depth-to-space; columns of other phases are
    # zero in a phase's K rows, so one weight matrix serves all phases.
    col_blocks, w_rows = [], []
    for rh in range(sH):
        nH = len(range(rh, Ho, sH))
        for rw in range(sW):
            nW = len(range(rw, Wo, sW))
            if nH == 0 or nW == 0:
                continue
            for (kh, eh) in taps_h[rh]:
                for (kw_, ew) in taps_w[rw]:
                    patch = x_ext[:, :, off_h + eh:off_h + eh + nH,
                                        off_w + ew:off_w + ew + nW]   # (N,Ci,nH,nW)
                    col = lax.pad(
                        patch, jnp.float32(0),
                        ((0, 0, 0), (0, 0, 0),
                         (rh, Ho - rh - (nH - 1) * sH - 1, sH - 1),
                         (rw, Wo - rw - (nW - 1) * sW - 1, sW - 1)))  # (N,Ci,Ho,Wo)
                    col_blocks.append(col)
                    w_rows.append(weight[:, :, kh, kw_].astype(jnp.float32))  # (Ci,Co)

    K = len(col_blocks) * Ci
    Kp = max(16, -(-K // 16) * 16)            # bf16-sublane friendly K padding
    if col_blocks:
        xcol = jnp.concatenate(col_blocks, axis=1).reshape(N, K, HW)
        wmat = jnp.transpose(jnp.concatenate(w_rows, axis=0), (1, 0))   # (Co, K)
    else:                                      # degenerate: no taps at all
        xcol = jnp.zeros((N, 0, HW), jnp.float32)
        wmat = jnp.zeros((Co, 0), jnp.float32)
    if Kp > K:
        xcol = jnp.pad(xcol, ((0, 0), (0, Kp - K), (0, 0)))
        wmat = jnp.pad(wmat, ((0, 0), (0, Kp - K)))
    xcol = xcol.astype(jnp.bfloat16)           # MXU operands; accumulation is f32
    wmat = wmat.astype(jnp.bfloat16)

    # ---- channel-block grid ("parallel": 2 programs -> both v7x TCs) --------
    n_cb = 2 if (Co % 2 == 0) else 1
    Co_blk = Co // n_cb
    Co_pb = max(Co_blk, 8)                     # sublane-aligned MXU row count
    wmat_b = wmat.reshape(n_cb, Co_blk, Kp)
    if Co_pb > Co_blk:
        wmat_b = jnp.pad(wmat_b, ((0, 0), (0, Co_pb - Co_blk), (0, 0)))
    gamma_b = gamma.astype(jnp.float32).reshape(n_cb, Co_blk, 1)
    beta_b = beta.astype(jnp.float32).reshape(n_cb, Co_blk, 1)
    # The ConvTranspose2d bias shifts both the activations and the batch mean,
    # so it cancels exactly under training-mode BN; `bias` is kept for API
    # parity but has no effect on the output.
    del bias

    cost = pl.CostEstimate(
        flops=2 * N * Co * Kp * HW + 8 * N * Co * HW,
        transcendentals=Co,
        bytes_accessed=(xcol.size * 2 + wmat_b.size * 2
                        + 2 * Co * 4 + N * Co * HW * 4))

    out = pl.pallas_call(
        _fused_decoder_kernel,
        out_shape=jax.ShapeDtypeStruct((N, n_cb, Co_blk, HW), jnp.float32),
        grid=(n_cb,),
        in_specs=[
            pl.BlockSpec((N, Kp, HW), lambda c: (0, 0, 0)),        # shared im2col
            pl.BlockSpec((None, Co_pb, Kp), lambda c: (c, 0, 0)),  # per-block weights
            pl.BlockSpec((None, Co_blk, 1), lambda c: (c, 0, 0)),  # gamma
            pl.BlockSpec((None, Co_blk, 1), lambda c: (c, 0, 0)),  # beta
        ],
        out_specs=pl.BlockSpec((N, None, Co_blk, HW), lambda c: (0, c, 0, 0)),
        compiler_params=pltpu.CompilerParams(
            dimension_semantics=("parallel",)),
        cost_estimate=cost,
    )(xcol, wmat_b, gamma_b, beta_b)

    # depth-to-space is already folded into the column ordering -> free reshape
    return out.reshape(N, Co, Ho, Wo)


# ----------------------------------------------------------------------------
# pure-JAX reference (ground truth)
# ----------------------------------------------------------------------------
def decoder_reference(x_nchw, weight, bias, gamma, beta,
                      stride, padding, output_padding, conv_dtype=jnp.float32):
    Ci, Co, kH, kW = weight.shape
    sH, sW = stride
    pH, pW = padding
    opH, opW = output_padding
    w_oihw = jnp.transpose(jnp.flip(weight, axis=(2, 3)), (1, 0, 2, 3))
    y = lax.conv_general_dilated(
        x_nchw.astype(conv_dtype), w_oihw.astype(conv_dtype),
        window_strides=(1, 1),
        padding=[(kH - 1 - pH, kH - 1 - pH + opH),
                 (kW - 1 - pW, kW - 1 - pW + opW)],
        lhs_dilation=(sH, sW),
        dimension_numbers=('NCHW', 'OIHW', 'NCHW'),
        preferred_element_type=jnp.float32)
    y = y + bias[None, :, None, None]
    mean = jnp.mean(y, axis=(0, 2, 3), keepdims=True)
    var = jnp.mean((y - mean) ** 2, axis=(0, 2, 3), keepdims=True)
    z = (y - mean) * lax.rsqrt(var + BN_EPS) * gamma[None, :, None, None] \
        + beta[None, :, None, None]
    return jnp.where(z >= 0, z, LEAKY_SLOPE * z)


if __name__ == "__main__":
    # Small, module-consistent configuration.
    N, Ci, H, W = 2, 4, 16, 16
    Co = 8
    kernel_size = (3, 3)
    stride = (2, 2)
    padding = (1, 1)
    output_padding = (1, 1)
    kH, kW = kernel_size

    key = jax.random.PRNGKey(0)
    kx, kw_, kb, kg, kbe = jax.random.split(key, 5)

    x = jax.random.normal(kx, (N, Ci, H, W), jnp.float32)

    # Deterministic parameter init (shapes per nn.ConvTranspose2d / nn.BatchNorm2d).
    bound = 1.0 / math.sqrt(Ci * kH * kW)
    weight = jax.random.uniform(kw_, (Ci, Co, kH, kW), jnp.float32, -bound, bound)
    bias = jax.random.uniform(kb, (Co,), jnp.float32, -bound, bound)
    gamma = 1.0 + 0.1 * jax.random.normal(kg, (Co,), jnp.float32)
    beta = 0.1 * jax.random.normal(kbe, (Co,), jnp.float32)

    out = decoder_forward(x, weight, bias, gamma, beta,
                          stride, padding, output_padding)
    out = jax.block_until_ready(out)

    Ho = (H - 1) * stride[0] - 2 * padding[0] + kH + output_padding[0]
    Wo = (W - 1) * stride[1] - 2 * padding[1] + kW + output_padding[1]
    assert out.shape == (N, Co, Ho, Wo), out.shape

    # 1) matched-precision check: validates the phase-merged block-sparse-K
    #    im2col / interleaved-column / fused-BN structure with the same
    #    bf16-operand, f32-accumulate conv.
    ref_bf16 = jax.block_until_ready(decoder_reference(
        x, weight, bias, gamma, beta, stride, padding, output_padding,
        conv_dtype=jnp.bfloat16))
    if not jnp.allclose(out, ref_bf16, atol=2e-3, rtol=2e-3):
        max_err = float(jnp.max(jnp.abs(out - ref_bf16)))
        raise AssertionError(
            f"mismatch vs matched-precision reference, max_err={max_err}")

    # 2) full-f32 check: difference is bounded by bf16 operand rounding of the
    #    MXU conv (amplified ~1/std by the BatchNorm normalization).
    ref_f32 = jax.block_until_ready(decoder_reference(
        x, weight, bias, gamma, beta, stride, padding, output_padding,
        conv_dtype=jnp.float32))
    if not jnp.allclose(out, ref_f32, atol=5e-2, rtol=5e-2):
        max_err = float(jnp.max(jnp.abs(out - ref_f32)))
        raise AssertionError(f"mismatch vs f32 reference, max_err={max_err}")

    print("KERNEL_OK")
</pallas_src>

<mosaic_0001>
module attributes {stable_mosaic.version = 11 : i64} {
  func.func @_fused_decoder_kernel(%arg0: i32, %arg1: memref<2x48x1024xbf16, #tpu.memory_space<vmem>>, %arg2: memref<1x8x48xbf16, #tpu.memory_space<vmem>>, %arg3: memref<1x4x1xf32, #tpu.memory_space<vmem>>, %arg4: memref<1x4x1xf32, #tpu.memory_space<vmem>>, %arg5: memref<2x1x4x1024xf32, #tpu.memory_space<vmem>>) attributes {dimension_semantics = [#tpu.dimension_semantics<parallel>], iteration_bounds = array<i64: 2>, scalar_prefetch = 0 : i64, scratch_operands = 0 : i64, tpu.core_type = #tpu.core_type<tc>, window_params = [{pipeline_mode = #tpu.pipeline_mode<synchronous>, transform_indices = @transform_0, window_bounds = array<i64: 2, 48, 1024>}, {transform_indices = @transform_1, window_bounds = array<i64: 1, 8, 48>}, {transform_indices = @transform_2, window_bounds = array<i64: 1, 4, 1>}, {transform_indices = @transform_3, window_bounds = array<i64: 1, 4, 1>}, {transform_indices = @transform_4, window_bounds = array<i64: 2, 1, 4, 1024>}]} {
    %c0 = arith.constant 0 : index
    %c0_0 = arith.constant 0 : index
    %c0_1 = arith.constant 0 : index
    %0 = vector.load %arg2[%c0, %c0_0, %c0_1] : memref<1x8x48xbf16, #tpu.memory_space<vmem>>, vector<1x8x48xbf16>
    %1 = vector.shape_cast %0 : vector<1x8x48xbf16> to vector<8x48xbf16>
    %cst = arith.constant 0.000000e+00 : f32
    %2 = vector.broadcast %cst : f32 to vector<4x1xf32>
    %c0_2 = arith.constant 0 : index
    %c0_3 = arith.constant 0 : index
    %c0_4 = arith.constant 0 : index
    %3 = vector.load %arg1[%c0_2, %c0_3, %c0_4] : memref<2x48x1024xbf16, #tpu.memory_space<vmem>>, vector<1x48x1024xbf16>
    %4 = vector.shape_cast %3 : vector<1x48x1024xbf16> to vector<48x1024xbf16>
    %cst_5 = arith.constant dense<0.000000e+00> : vector<8x1024xf32>
    %5 = tpu.matmul %1, %4, %cst_5 {dimension_numbers = #tpu.dot_dimension_numbers<[1], [0], [0], [1], [0, 0, 1, 1], [], []>} : vector<8x48xbf16>, vector<48x1024xbf16>, vector<8x1024xf32> -> vector<8x1024xf32>
    %6 = vector.extract_strided_slice %5 {offsets = [0, 0], sizes = [4, 1024], strides = [1, 1]} : vector<8x1024xf32> to vector<4x1024xf32>
    %cst_6 = arith.constant dense<0.000000e+00> : vector<4xf32>
    %7 = vector.multi_reduction <add>, %6, %cst_6 [1] : vector<4x1024xf32> to vector<4xf32>
    %8 = vector.shape_cast %7 : vector<4xf32> to vector<4x1xf32>
    %9 = arith.addf %2, %8 : vector<4x1xf32>
    %c1 = arith.constant 1 : index
    %c0_7 = arith.constant 0 : index
    %c0_8 = arith.constant 0 : index
    %10 = vector.load %arg1[%c1, %c0_7, %c0_8] : memref<2x48x1024xbf16, #tpu.memory_space<vmem>>, vector<1x48x1024xbf16>
    %11 = vector.shape_cast %10 : vector<1x48x1024xbf16> to vector<48x1024xbf16>
    %cst_9 = arith.constant dense<0.000000e+00> : vector<8x1024xf32>
    %12 = tpu.matmul %1, %11, %cst_9 {dimension_numbers = #tpu.dot_dimension_numbers<[1], [0], [0], [1], [0, 0, 1, 1], [], []>} : vector<8x48xbf16>, vector<48x1024xbf16>, vector<8x1024xf32> -> vector<8x1024xf32>
    %13 = vector.extract_strided_slice %12 {offsets = [0, 0], sizes = [4, 1024], strides = [1, 1]} : vector<8x1024xf32> to vector<4x1024xf32>
    %cst_10 = arith.constant dense<0.000000e+00> : vector<4xf32>
    %14 = vector.multi_reduction <add>, %13, %cst_10 [1] : vector<4x1024xf32> to vector<4xf32>
    %15 = vector.shape_cast %14 : vector<4xf32> to vector<4x1xf32>
    %16 = arith.addf %9, %15 : vector<4x1xf32>
    %cst_11 = arith.constant 4.8828125E-4 : f32
    %17 = vector.broadcast %cst_11 : f32 to vector<4x1xf32>
    %18 = arith.mulf %16, %17 : vector<4x1xf32>
    %cst_12 = arith.constant 0.000000e+00 : f32
    %19 = vector.broadcast %cst_12 : f32 to vector<4x1xf32>
    %20 = vector.broadcast %18 : vector<4x1xf32> to vector<4x1024xf32>
    %21 = arith.subf %6, %20 : vector<4x1024xf32>
    %22 = arith.mulf %21, %21 : vector<4x1024xf32>
    %cst_13 = arith.constant dense<0.000000e+00> : vector<4xf32>
    %23 = vector.multi_reduction <add>, %22, %cst_13 [1] : vector<4x1024xf32> to vector<4xf32>
    %24 = vector.shape_cast %23 : vector<4xf32> to vector<4x1xf32>
    %25 = arith.addf %19, %24 : vector<4x1xf32>
    %26 = vector.broadcast %18 : vector<4x1xf32> to vector<4x1024xf32>
    %27 = arith.subf %13, %26 : vector<4x1024xf32>
    %28 = arith.mulf %27, %27 : vector<4x1024xf32>
    %cst_14 = arith.constant dense<0.000000e+00> : vector<4xf32>
    %29 = vector.multi_reduction <add>, %28, %cst_14 [1] : vector<4x1024xf32> to vector<4xf32>
    %30 = vector.shape_cast %29 : vector<4xf32> to vector<4x1xf32>
    %31 = arith.addf %25, %30 : vector<4x1xf32>
    %cst_15 = arith.constant 4.8828125E-4 : f32
    %32 = vector.broadcast %cst_15 : f32 to vector<4x1xf32>
    %33 = arith.mulf %31, %32 : vector<4x1xf32>
    %c0_16 = arith.constant 0 : index
    %c0_17 = arith.constant 0 : index
    %c0_18 = arith.constant 0 : index
    %34 = vector.load %arg3[%c0_16, %c0_17, %c0_18] : memref<1x4x1xf32, #tpu.memory_space<vmem>>, vector<1x4x1xf32>
    %35 = vector.shape_cast %34 : vector<1x4x1xf32> to vector<4x1xf32>
    %cst_19 = arith.constant 9.99999974E-6 : f32
    %36 = vector.broadcast %cst_19 : f32 to vector<4x1xf32>
    %37 = arith.addf %33, %36 : vector<4x1xf32>
    %38 = math.rsqrt %37 : vector<4x1xf32>
    %39 = arith.mulf %35, %38 : vector<4x1xf32>
    %c0_20 = arith.constant 0 : index
    %c0_21 = arith.constant 0 : index
    %c0_22 = arith.constant 0 : index
    %40 = vector.load %arg4[%c0_20, %c0_21, %c0_22] : memref<1x4x1xf32, #tpu.memory_space<vmem>>, vector<1x4x1xf32>
    %41 = vector.shape_cast %40 : vector<1x4x1xf32> to vector<4x1xf32>
    %42 = arith.mulf %18, %39 : vector<4x1xf32>
    %43 = arith.subf %41, %42 : vector<4x1xf32>
    %44 = vector.broadcast %39 : vector<4x1xf32> to vector<4x1024xf32>
    %45 = arith.mulf %6, %44 : vector<4x1024xf32>
    %46 = vector.broadcast %43 : vector<4x1xf32> to vector<4x1024xf32>
    %47 = arith.addf %45, %46 : vector<4x1024xf32>
    %cst_23 = arith.constant 0.00999999977 : f32
    %48 = vector.broadcast %cst_23 : f32 to vector<4x1024xf32>
    %49 = arith.mulf %48, %47 : vector<4x1024xf32>
    %50 = arith.maximumf %47, %49 : vector<4x1024xf32>
    %c0_24 = arith.constant 0 : index
    %c0_25 = arith.constant 0 : index
    %c0_26 = arith.constant 0 : index
    %c0_27 = arith.constant 0 : index
    %51 = vector.load %arg5[%c0_24, %c0_25, %c0_26, %c0_27] : memref<2x1x4x1024xf32, #tpu.memory_space<vmem>>, vector<1x1x4x1024xf32>
    %52 = vector.shape_cast %51 : vector<1x1x4x1024xf32> to vector<4x1024xf32>
    %53 = vector.shape_cast %50 : vector<4x1024xf32> to vector<1x1x4x1024xf32>
    tpu.vector_store %arg5[%c0_24, %c0_25, %c0_26, %c0_27], %53 {strides = array<i32>} : memref<2x1x4x1024xf32, #tpu.memory_space<vmem>>, vector<1x1x4x1024xf32>,
    %54 = vector.broadcast %39 : vector<4x1xf32> to vector<4x1024xf32>
    %55 = arith.mulf %13, %54 : vector<4x1024xf32>
    %56 = vector.broadcast %43 : vector<4x1xf32> to vector<4x1024xf32>
    %57 = arith.addf %55, %56 : vector<4x1024xf32>
    %cst_28 = arith.constant 0.00999999977 : f32
    %58 = vector.broadcast %cst_28 : f32 to vector<4x1024xf32>
    %59 = arith.mulf %58, %57 : vector<4x1024xf32>
    %60 = arith.maximumf %57, %59 : vector<4x1024xf32>
    %c1_29 = arith.constant 1 : index
    %c0_30 = arith.constant 0 : index
    %c0_31 = arith.constant 0 : index
    %c0_32 = arith.constant 0 : index
    %61 = vector.load %arg5[%c1_29, %c0_30, %c0_31, %c0_32] : memref<2x1x4x1024xf32, #tpu.memory_space<vmem>>, vector<1x1x4x1024xf32>
    %62 = vector.shape_cast %61 : vector<1x1x4x1024xf32> to vector<4x1024xf32>
    %63 = vector.shape_cast %60 : vector<4x1024xf32> to vector<1x1x4x1024xf32>
    tpu.vector_store %arg5[%c1_29, %c0_30, %c0_31, %c0_32], %63 {strides = array<i32>} : memref<2x1x4x1024xf32, #tpu.memory_space<vmem>>, vector<1x1x4x1024xf32>,
    return
  }
  func.func @transform_0(%arg0: i32) -> (i32, i32, i32) {
    %c0_i32 = arith.constant 0 : i32
    %c0_i32_0 = arith.constant 0 : i32
    %c0_i32_1 = arith.constant 0 : i32
    %c0_i32_2 = arith.constant 0 : i32
    return %c0_i32, %c0_i32_0, %c0_i32_1 : i32, i32, i32
  }
  func.func @transform_1(%arg0: i32) -> (i32, i32, i32) {
    %c0_i32 = arith.constant 0 : i32
    %c0_i32_0 = arith.constant 0 : i32
    %c0_i32_1 = arith.constant 0 : i32
    return %arg0, %c0_i32, %c0_i32_0 : i32, i32, i32
  }
  func.func @transform_2(%arg0: i32) -> (i32, i32, i32) {
    %c0_i32 = arith.constant 0 : i32
    %c0_i32_0 = arith.constant 0 : i32
    %c0_i32_1 = arith.constant 0 : i32
    return %arg0, %c0_i32, %c0_i32_0 : i32, i32, i32
  }
  func.func @transform_3(%arg0: i32) -> (i32, i32, i32) {
    %c0_i32 = arith.constant 0 : i32
    %c0_i32_0 = arith.constant 0 : i32
    %c0_i32_1 = arith.constant 0 : i32
    return %arg0, %c0_i32, %c0_i32_0 : i32, i32, i32
  }
  func.func @transform_4(%arg0: i32) -> (i32, i32, i32, i32) {
    %c0_i32 = arith.constant 0 : i32
    %c0_i32_0 = arith.constant 0 : i32
    %c0_i32_1 = arith.constant 0 : i32
    %c0_i32_2 = arith.constant 0 : i32
    return %c0_i32, %arg0, %c0_i32_0, %c0_i32_1 : i32, i32, i32, i32
  }
}

</mosaic_0001>

<bundles_post_ra>
// kernel: tpu_custom_call.1
= control target key start
LH: loop header
LB: loop body
LE: loop exit
PB: predicated region body
PF: predicated region fallthrough
CT: control target
= control target key end

     0   :  { %9 = vsyncpa [#allocation3], 0  ;;  %s1885_s0 = inlined_call_operand.hbm [shape: bf16[2,48,1024], index: 0, kind: input, shape index: {}]   ;;  %s1886_s1 = inlined_call_operand.vmem [shape: bf16[2,8,48], index: 1, kind: input, shape index: {}]   ;;  %s1887_s2 = inlined_call_operand.vmem [shape: f32[2,4,1], index: 2, kind: input, shape index: {}]   ;;  %s1888_s3 = inlined_call_operand.vmem [shape: f32[2,4,1], index: 3, kind: input, shape index: {}]   ;;  %s1889_s4 = inlined_call_operand.hbm [shape: f32[2,2,4,1024], index: 4, kind: output, shape index: {}]  }
   0x1   :  { %10 = vsyncpa [#allocation4], 0 }
   0x2   :  { %12 = vsyncpa [#allocation4 + $0x1], 0  ;;  %s1573_s15 = smov 0   ;;  %s1575_s16 = smov 0  }
   0x3   :  { %s1577_s17 = smov 0   ;;  %s1579_s18 = smov 0  }
   0x4 LB: > { %s1594_s19 = sadd.s32 4294967295, %s1539_s18   ;;  %s1107_s20 = sadd.s32 4294967294, %s1539_s18   ;;  %s1539_s18 = sphi %s1579_s18, %s1895_s18   ;;  %s1535_s17 = sphi %s1577_s17, %s1894_s17   ;;  %s1531_s16 = sphi %s1575_s16, %s1893_s16   ;;  %s1527_s15 = sphi %s1573_s15, %s1892_s15  }
   0x5   : > { %s1598_s21 = sadd.s32 1, %s1539_s18   ;;  %s124_s22 = sadd.s32 1, %s1535_s17 }
   0x6   : > { %s121_s23 = ssub.s32 %s1539_s18, %s1598_s21  ;;  %p134_p0 = scmp.ne.s32.totalorder %s1535_s17, %s1531_s16 }
   0x7   : > { %p122_p1 = scmp.eq.s32.totalorder %s121_s23, 0  ;;  %p135_p2 = scmp.eq.s32.totalorder %s1594_s19, 1 }
   0x8   : > { %p140_p3 = scmp.ne.s32.totalorder %s1531_s16, %s1527_s15  ;;  %p141_p4 = scmp.eq.s32.totalorder %s1107_s20, 1 }
   0x9   : > { %s1609_s24 = scalar_select %p122_p1, %s1535_s17, %s124_s22  }
   0xa   : > { %p1611_p5 = por %p135_p2, %p134_p0  ;;  %p1615_p6 = por %p141_p4, %p140_p3 }
   0xb   : > { %p1108_p7 = scmp.ge.s32.totalorder %s1539_s18, 1  ;;  %p148_p8 = scmp.lt.s32.totalorder %s1539_s18, 3 }
   0xc   : > { %p1397_p9 = scmp.eq.s32.totalorder %s1594_s19, 0  ;;  %s159_s29 = sshll.u32 %s1885_s0, 4  ;;  %s160_s29 = int_to_ptr.hbm [resolvable:$true] %s159_s29 }
   0xd   : > { %p149_p10 = pnand %p1108_p7, %p148_p8  ;;  %s1541_s30 = smov [#allocation2]  }
   0xe   : > { %s161_s5 = sshll.u32 %s1541_s30, 4  ;;  %s1542_s6 = smov 512   ;;  %s162_s5 = int_to_ptr.vmem [resolvable:$true] %s161_s5 }
   0xf   : > { %p1389_p11 = pneg %p149_p10  ;;  %s1543_s7 = smov 32  }
  0x10   : > { %198 = sbr.rel (%p149_p10) target bundleno = 636 (0x27c), region = 36 }
  0x11   : > { %p1390_p12 = pnand %p1397_p9, %p1389_p11 }
  0x13   : > { %1392 = dma.hbm_to_vmem [thread:$0]  (!%p1390_p12), %s160_s29, 6144, %s162_s5, [#allocation3], %s1542_s6, %s1542_s6, %s1543_s7  }
  0x15   : > { %1518 = dma.done.wait (%p1397_p9), [#allocation3], 6144  }
  0x16   : > { %1520 = vsyncadd (%p1397_p9), [#allocation3], 4294961152  ;;  %p232_p13 = scmp.lt.s32.totalorder %s1594_s19, 1  ;;  %v1183_v0 = vld [vmem:[#allocation2 + $0x80] sm:$0xf]  ;;  %vm390_vm0 = vcmask 392192  }
  0x17   : > { %v1354_v1 = vld [vmem:[#allocation2 + $0x9c] sm:$0xf0]  ;;  %v1350_v2 = vld [vmem:[#allocation2 + $0x84] sm:$0xf]  ;;  %v1191_v5 = vld [vmem:[#allocation2 + $0x88] sm:$0xf] }
  0x18   : > { %s233_s8 = scalar_select %p232_p13, %s1594_s19, 1  ;;  %v1184_v3 = vor.u32 %v1354_v1, %v1183_v0  ;;  %v1185_v4 = vld [vmem:[#allocation2 + $0xa0] sm:$0xf0]  ;;  %v1355_v6 = vld [vmem:[#allocation2 + $0xa4] sm:$0xf0]  ;;  %vm498_vm1 = vcmask 1043456  }
  0x19   : > { %v1188_v7 = vor.u32 %v1350_v2, %v1185_v4  ;;  %v1192_v8 = vor.u32 %v1355_v6, %v1191_v5  ;;  %v1351_v9 = vld [vmem:[#allocation2 + $0x8c] sm:$0xf]  ;;  %v1151_v11 = vld [vmem:[#allocation2 + $0x40] sm:$0xf]  ;;  %v1342_v14 = vld [vmem:[#allocation2 + $0x44] sm:$0xf] }
  0x1a   : > { %s1633_s9 = sshll.u32 %s233_s8, 2  ;;  %v1193_v10 = vld [vmem:[#allocation2 + $0xa8] sm:$0xf0]  ;;  %399 = vmatpush.bf16.msra.mxu0 %v1184_v3  ;;  %v1346_v13 = vld [vmem:[#allocation2 + $0x5c] sm:$0xf0]  ;;  %s229_s28 = sand.u32 1, %s1531_s16  }
  0x1b   : > { %v1196_v12 = vor.u32 %v1351_v9, %v1193_v10  ;;  %v1153_v15 = vld [vmem:[#allocation2 + $0x60] sm:$0xf0]  ;;  %412 = vmatpush.bf16.msra.mxu1 %v1188_v7  ;;  %425 = vmatpush.bf16.msra.mxu2 %v1192_v8  ;;  %v1152_v16 = vor.u32 %v1346_v13, %v1151_v11  ;;  %v1159_v18 = vld [vmem:[#allocation2 + $0x48] sm:$0xf]  ;;  %v1343_v20 = vld [vmem:[#allocation2 + $0x4c] sm:$0xf]  ;;  %s235_s12 = scalar_lea.vmem %s1886_s1, %s1633_s9  ;;  %s239_s20 = scalar_lea.vmem %s1887_s2, %s1633_s9 }
  0x1c   : > { %v1156_v17 = vor.u32 %v1342_v14, %v1153_v15  ;;  %v1347_v19 = vld [vmem:[#allocation2 + $0x64] sm:$0xf0]  ;;  %v1161_v22 = vld [vmem:[#allocation2 + $0x68] sm:$0xf0]  ;;  %v1119_v23 = vld [vmem:[#allocation2] sm:$0xf]  ;;  %s243_s27 = scalar_lea.vmem %s1888_s3, %s1633_s9 }
  0x1d   : > { %438 = vmatpush.bf16.msra.mxu3 %v1196_v12  ;;  %v1160_v21 = vor.u32 %v1347_v19, %v1159_v18  ;;  %v1338_v24 = vld [vmem:[#allocation2 + $0x1c] sm:$0xf0]  ;;  %v1164_v25 = vor.u32 %v1343_v20, %v1161_v22  ;;  %v1334_v26 = vld [vmem:[#allocation2 + $0x4] sm:$0xf]  ;;  %v1127_v28 = vld [vmem:[#allocation2 + $0x8] sm:$0xf] }
  0x1e   : > { %v1121_v27 = vld [vmem:[#allocation2 + $0x20] sm:$0xf0]  ;;  %400 = vmatpush.bf16.msra.mxu0 %v1152_v16  ;;  %v1120_v29 = vor.u32 %v1338_v24, %v1119_v23  ;;  %v1339_v30 = vld [vmem:[#allocation2 + $0x24] sm:$0xf0]  ;;  %v1335_v31 = vld [vmem:[#allocation2 + $0xc] sm:$0xf] }
  0x1f   : > { %v1129_v32 = vld [vmem:[#allocation2 + $0x28] sm:$0xf0]  ;;  %413 = vmatpush.bf16.msra.mxu1 %v1156_v17  ;;  %426 = vmatpush.bf16.msra.mxu2 %v1160_v21  ;;  %v1124_v33 = vor.u32 %v1334_v26, %v1121_v27  ;;  %v1128_v34 = vor.u32 %v1339_v30, %v1127_v28  ;;  %v1207_v35 = vld [vmem:[#allocation2 + $0x98] sm:$0xf]  ;;  %v1199_v39 = vld [vmem:[#allocation2 + $0x90] sm:$0xf] }
  0x20   : > { %v1357_v36 = vld [vmem:[#allocation2 + $0xb4] sm:$0xf0]  ;;  %v1132_v37 = vor.u32 %v1335_v31, %v1129_v32  ;;  %v1356_v40 = vld [vmem:[#allocation2 + $0xac] sm:$0xf0]  ;;  %v1353_v41 = vld [vmem:[#allocation2 + $0x9c] sm:$0xf] }
  0x21   : > { %439 = vmatpush.bf16.msra.mxu3 %v1164_v25  ;;  %v1208_v38 = vor.u32 %v1357_v36, %v1207_v35  ;;  %v1209_v42 = vld [vmem:[#allocation2 + $0xb8] sm:$0xf0]  ;;  %v1352_v43 = vld [vmem:[#allocation2 + $0x94] sm:$0xf]  ;;  %v1639_v45 = vld [vmem:[%s235_s12] sm:$0xf]  ;;  %v1200_v49 = vor.u32 %v1356_v40, %v1199_v39 }
  0x22   : > { %v1201_v44 = vld [vmem:[#allocation2 + $0xb0] sm:$0xf0]  ;;  %401 = vmatpush.bf16.msra.mxu0 %v1120_v29  ;;  %v1212_v46 = vor.u32 %v1353_v41, %v1209_v42  ;;  %v1175_v47 = vld [vmem:[#allocation2 + $0x58] sm:$0xf]  ;;  %v1345_v50 = vld [vmem:[#allocation2 + $0x5c] sm:$0xf] }
  0x23   : > { %v1349_v48 = vld [vmem:[#allocation2 + $0x74] sm:$0xf0]  ;;  %414 = vmatpush.bf16.msra.mxu1 %v1124_v33  ;;  %427 = vmatpush.bf16.msra.mxu2 %v1128_v34  ;;  %v1177_v51 = vld [vmem:[#allocation2 + $0x78] sm:$0xf0]  ;;  %v1204_v52 = vor.u32 %v1352_v43, %v1201_v44  ;;  %v1167_v54 = vld [vmem:[#allocation2 + $0x50] sm:$0xf] }
  0x24   : > { %v1176_v53 = vor.u32 %v1349_v48, %v1175_v47  ;;  %v1348_v55 = vld [vmem:[#allocation2 + $0x6c] sm:$0xf0]  ;;  %v1344_v56 = vld [vmem:[#allocation2 + $0x54] sm:$0xf]  ;;  %v1180_v57 = vor.u32 %v1345_v50, %v1177_v51  ;;  %v1143_v59 = vld [vmem:[#allocation2 + $0x18] sm:$0xf] }
  0x25   : > { %440 = vmatpush.bf16.msra.mxu3 %v1132_v37  ;;  %1213 = vmatmul.msk.bf16.vlgmr.msra.gmra.mxu0 %vm390_vm0, %v1639_v45  ;;  %v1169_v58 = vld [vmem:[#allocation2 + $0x70] sm:$0xf0]  ;;  %v1341_v60 = vld [vmem:[#allocation2 + $0x34] sm:$0xf0]  ;;  %v1135_v61 = vld [vmem:[#allocation2 + $0x10] sm:$0xf]  ;;  %v1168_v0 = vor.u32 %v1348_v55, %v1167_v54 }
  0x26   : > { %1214 = vmatmul.msk.bf16.vlgmr.msra.gmra.mxu1 %vm390_vm0, %v1639_v45  ;;  %1215 = vmatmul.msk.bf16.vlgmr.msra.gmra.mxu2 %vm390_vm0, %v1639_v45  ;;  %v1340_v62 = vld [vmem:[#allocation2 + $0x2c] sm:$0xf0]  ;;  %v1337_v63 = vld [vmem:[#allocation2 + $0x1c] sm:$0xf]  ;;  %v1336_v1 = vld [vmem:[#allocation2 + $0x14] sm:$0xf]  ;;  %v1172_v5 = vor.u32 %v1344_v56, %v1169_v58  ;;  %v1144_v6 = vor.u32 %v1341_v60, %v1143_v59 }
  0x27   : > { %477 = vmatpush.bf16.msrb.mxu2 %v1208_v38  ;;  %451 = vmatpush.bf16.msrb.mxu0 %v1200_v49  ;;  %v1145_v2 = vld [vmem:[#allocation2 + $0x38] sm:$0xf0]  ;;  %v1295_v3 = vld [vmem:[#allocation2 + $0x148] sm:$0xf]  ;;  %v1137_v7 = vld [vmem:[#allocation2 + $0x30] sm:$0xf0]  ;;  %v1136_v19 = vor.u32 %v1340_v62, %v1135_v61 }
  0x28   : > { %1216 = vmatmul.msk.bf16.vlgmr.msra.gmra.mxu3 %vm390_vm0, %v1639_v45  ;;  %v1379_v4 = vld [vmem:[#allocation2 + $0x164] sm:$0xf0]  ;;  %464 = vmatpush.bf16.msrb.mxu1 %v1204_v52  ;;  %v1287_v8 = vld [vmem:[#allocation2 + $0x140] sm:$0xf]  ;;  %v1375_v9 = vld [vmem:[#allocation2 + $0x14c] sm:$0xf]  ;;  %v1148_v10 = vor.u32 %v1337_v63, %v1145_v2  ;;  %v1140_v22 = vor.u32 %v1336_v1, %v1137_v7 }
  0x29   : > { %490 = vmatpush.bf16.msrb.mxu3 %v1212_v46  ;;  %v1296_v11 = vor.u32 %v1379_v4, %v1295_v3  ;;  %v1378_v12 = vld [vmem:[#allocation2 + $0x15c] sm:$0xf0]  ;;  %v1297_v13 = vld [vmem:[#allocation2 + $0x168] sm:$0xf0]  ;;  %v1374_v14 = vld [vmem:[#allocation2 + $0x144] sm:$0xf] }
  0x2a   : > { %v1300_v15 = vor.u32 %v1375_v9, %v1297_v13  ;;  %v1289_v16 = vld [vmem:[#allocation2 + $0x160] sm:$0xf0]  ;;  %v1263_v17 = vld [vmem:[#allocation2 + $0x108] sm:$0xf]  ;;  %v1367_v20 = vld [vmem:[#allocation2 + $0x10c] sm:$0xf]  ;;  %v1288_v23 = vor.u32 %v1378_v12, %v1287_v8 }
  0x2b   : > { %478 = vmatpush.bf16.msrb.mxu2 %v1176_v53  ;;  %v1371_v18 = vld [vmem:[#allocation2 + $0x124] sm:$0xf0]  ;;  %452 = vmatpush.bf16.msrb.mxu0 %v1168_v0  ;;  %v1265_v21 = vld [vmem:[#allocation2 + $0x128] sm:$0xf0]  ;;  %v1292_v24 = vor.u32 %v1374_v14, %v1289_v16  ;;  %v1255_v26 = vld [vmem:[#allocation2 + $0x100] sm:$0xf] }
  0x2c   : > { %465 = vmatpush.bf16.msrb.mxu1 %v1172_v5  ;;  %v1264_v25 = vor.u32 %v1371_v18, %v1263_v17  ;;  %v1370_v27 = vld [vmem:[#allocation2 + $0x11c] sm:$0xf0]  ;;  %v1268_v28 = vor.u32 %v1367_v20, %v1265_v21  ;;  %v1366_v29 = vld [vmem:[#allocation2 + $0x104] sm:$0xf]  ;;  %v1231_v31 = vld [vmem:[#allocation2 + $0xc8] sm:$0xf] }
  0x2d   : > { %491 = vmatpush.bf16.msrb.mxu3 %v1180_v57  ;;  %v1257_v30 = vld [vmem:[#allocation2 + $0x120] sm:$0xf0]  ;;  %v1363_v32 = vld [vmem:[#allocation2 + $0xe4] sm:$0xf0]  ;;  %v1256_v33 = vor.u32 %v1370_v27, %v1255_v26  ;;  %v1223_v34 = vld [vmem:[#allocation2 + $0xc0] sm:$0xf] }
  0x2e   : > { %v1362_v35 = vld [vmem:[#allocation2 + $0xdc] sm:$0xf0]  ;;  %v1358_v36 = vld [vmem:[#allocation2 + $0xc4] sm:$0xf]  ;;  %v1260_v37 = vor.u32 %v1366_v29, %v1257_v30  ;;  %v1359_v39 = vld [vmem:[#allocation2 + $0xcc] sm:$0xf]  ;;  %v1232_v44 = vor.u32 %v1363_v32, %v1231_v31 }
  0x2f   : > { %479 = vmatpush.bf16.msrb.mxu2 %v1144_v6  ;;  %453 = vmatpush.bf16.msrb.mxu0 %v1136_v19  ;;  %v1225_v38 = vld [vmem:[#allocation2 + $0xe0] sm:$0xf0]  ;;  %v1233_v40 = vld [vmem:[#allocation2 + $0xe8] sm:$0xf0]  ;;  %v1311_v41 = vld [vmem:[#allocation2 + $0x158] sm:$0xf]  ;;  %v1224_v49 = vor.u32 %v1362_v35, %v1223_v34 }
  0x30   : > { %466 = vmatpush.bf16.msrb.mxu1 %v1140_v22  ;;  %v1381_v42 = vld [vmem:[#allocation2 + $0x174] sm:$0xf0]  ;;  %v1303_v43 = vld [vmem:[#allocation2 + $0x150] sm:$0xf]  ;;  %v1377_v47 = vld [vmem:[#allocation2 + $0x15c] sm:$0xf]  ;;  %v1236_v50 = vor.u32 %v1359_v39, %v1233_v40  ;;  %v1228_v53 = vor.u32 %v1358_v36, %v1225_v38 }
  0x31   : > { %492 = vmatpush.bf16.msrb.mxu3 %v1148_v10  ;;  %v1380_v46 = vld [vmem:[#allocation2 + $0x16c] sm:$0xf0]  ;;  %v1313_v48 = vld [vmem:[#allocation2 + $0x178] sm:$0xf0]  ;;  %v1376_v51 = vld [vmem:[#allocation2 + $0x154] sm:$0xf]  ;;  %v1312_v54 = vor.u32 %v1381_v42, %v1311_v41 }
  0x32   : > { %v1305_v52 = vld [vmem:[#allocation2 + $0x170] sm:$0xf0]  ;;  %v1304_v55 = vor.u32 %v1380_v46, %v1303_v43  ;;  %v1316_v56 = vor.u32 %v1377_v47, %v1313_v48  ;;  %v1279_v57 = vld [vmem:[#allocation2 + $0x118] sm:$0xf]  ;;  %v1271_v59 = vld [vmem:[#allocation2 + $0x110] sm:$0xf] }
  0x33   : > { %693 = vmatpush.bf16.msra.mxu2 %v1296_v11  ;;  %667 = vmatpush.bf16.msra.mxu0 %v1288_v23  ;;  %v1373_v58 = vld [vmem:[#allocation2 + $0x134] sm:$0xf0]  ;;  %v1308_v60 = vor.u32 %v1376_v51, %v1305_v52  ;;  %v1372_v61 = vld [vmem:[#allocation2 + $0x12c] sm:$0xf0]  ;;  %v1369_v62 = vld [vmem:[#allocation2 + $0x11c] sm:$0xf] }
  0x34   : > { %680 = vmatpush.bf16.msra.mxu1 %v1292_v24  ;;  %v1281_v63 = vld [vmem:[#allocation2 + $0x138] sm:$0xf0]  ;;  %v1368_v0 = vld [vmem:[#allocation2 + $0x114] sm:$0xf]  ;;  %v1280_v2 = vor.u32 %v1373_v58, %v1279_v57  ;;  %v1272_v3 = vor.u32 %v1372_v61, %v1271_v59  ;;  %v1247_v5 = vld [vmem:[#allocation2 + $0xd8] sm:$0xf] }
  0x35   : > { %706 = vmatpush.bf16.msra.mxu3 %v1300_v15  ;;  %1217 = vmatmul.msk.bf16.vlgmr.msrb.gmra.mxu0 %vm390_vm0, %v1639_v45  ;;  %v1273_v1 = vld [vmem:[#allocation2 + $0x130] sm:$0xf0]  ;;  %v1284_v4 = vor.u32 %v1369_v62, %v1281_v63  ;;  %v1365_v6 = vld [vmem:[#allocation2 + $0xf4] sm:$0xf0]  ;;  %v1239_v7 = vld [vmem:[#allocation2 + $0xd0] sm:$0xf] }
  0x36   : > { %1218 = vmatmul.msk.bf16.vlgmr.msrb.gmra.mxu1 %vm390_vm0, %v1639_v45  ;;  %1219 = vmatmul.msk.bf16.vlgmr.msrb.gmra.mxu2 %vm390_vm0, %v1639_v45  ;;  %v1276_v8 = vor.u32 %v1368_v0, %v1273_v1  ;;  %v1364_v9 = vld [vmem:[#allocation2 + $0xec] sm:$0xf0]  ;;  %v1361_v10 = vld [vmem:[#allocation2 + $0xdc] sm:$0xf]  ;;  %v1360_v12 = vld [vmem:[#allocation2 + $0xd4] sm:$0xf]  ;;  %v1248_v14 = vor.u32 %v1365_v6, %v1247_v5 }
  0x37   : > { %694 = vmatpush.bf16.msra.mxu2 %v1264_v25  ;;  %668 = vmatpush.bf16.msra.mxu0 %v1256_v33  ;;  %v1249_v11 = vld [vmem:[#allocation2 + $0xf8] sm:$0xf0]  ;;  %v1241_v13 = vld [vmem:[#allocation2 + $0xf0] sm:$0xf0]  ;;  %v1240_v15 = vor.u32 %v1364_v9, %v1239_v7  ;;  %s1821_s29 = sshll.u32 %s229_s28, 6  ;;  %s1382_s30 = sshll.u32 %s1594_s19, 5 }
  0x38   : > { %681 = vmatpush.bf16.msra.mxu1 %v1260_v37  ;;  %1220 = vmatmul.msk.bf16.vlgmr.msrb.gmra.mxu3 %vm390_vm0, %v1639_v45  ;;  %v1252_v16 = vor.u32 %v1361_v10, %v1249_v11  ;;  %v1244_v17 = vor.u32 %v1360_v12, %v1241_v13  ;;  %s1830_s5 = scalar_lea.vmem [#allocation5], %s1821_s29  ;;  %s1005_s7 = scalar_lea.hbm %s1889_s4, %s1382_s30 }
  0x39   : > { %707 = vmatpush.bf16.msra.mxu3 %v1268_v28  ;;  %s1006_s8 = sshll.u32 %s1830_s5, 4  ;;  %s1008_s9 = sshll.u32 %s1005_s7, 4  ;;  %s1846_s8 = int_to_ptr.vmem [resolvable:$true] %s1006_s8  ;;  %s1009_s9 = int_to_ptr.hbm [resolvable:$true] %s1008_s9 }
  0x3a   : > { %s994_s10 = scalar_lea.sflag [#allocation4], %s229_s28  ;;  %s1487_s11 = sshra.s32 %s1009_s9, 4  ;;  %s1488_s11 = int_to_ptr.hbm [resolvable:$true] %s1487_s11 }
  0x3b   : > { %695 = vmatpush.bf16.msra.mxu2 %v1232_v44  ;;  %669 = vmatpush.bf16.msra.mxu0 %v1224_v49  ;;  %s1489_s12 = scalar_lea.hbm %s1488_s11, 64  ;;  %p1494_p3 = scmp.lt.s32.totalorder %s1488_s11, %s1889_s4 }
  0x3c   : > { %682 = vmatpush.bf16.msra.mxu1 %v1228_v53  ;;  %p1490_p0 = scmp.ne.s32.totalorder %s1488_s11, %s1489_s12 }
  0x3d   : > { %708 = vmatpush.bf16.msra.mxu3 %v1236_v50 }
  0x3e   : > { %p1491_p1 = pnand %p1490_p0, %p1611_p5 }
  0x3f   : > { %745 = vmatpush.bf16.msrb.mxu2 %v1312_v54  ;;  %719 = vmatpush.bf16.msrb.mxu0 %v1304_v55 }
  0x40   : > { %732 = vmatpush.bf16.msrb.mxu1 %v1308_v60  ;;  %p1492_p2 = pneg %p1491_p1 }
  0x41   : > { %758 = vmatpush.bf16.msrb.mxu3 %v1316_v56 }
  0x43   : > { %746 = vmatpush.bf16.msrb.mxu2 %v1280_v2  ;;  %720 = vmatpush.bf16.msrb.mxu0 %v1272_v3 }
  0x44   : > { %733 = vmatpush.bf16.msrb.mxu1 %v1276_v8 }
  0x45   : > { %759 = vmatpush.bf16.msrb.mxu3 %v1284_v4  ;;  %1317 = vmatmul.msk.bf16.vlgmr.msra.gmra.mxu0 %vm390_vm0, %v1639_v45 }
  0x46   : > { %1318 = vmatmul.msk.bf16.vlgmr.msra.gmra.mxu1 %vm390_vm0, %v1639_v45  ;;  %1319 = vmatmul.msk.bf16.vlgmr.msra.gmra.mxu2 %vm390_vm0, %v1639_v45 }
  0x47   : > { %747 = vmatpush.bf16.msrb.mxu2 %v1248_v14  ;;  %721 = vmatpush.bf16.msrb.mxu0 %v1240_v15 }
  0x48   : > { %734 = vmatpush.bf16.msrb.mxu1 %v1244_v17  ;;  %1320 = vmatmul.msk.bf16.vlgmr.msra.gmra.mxu3 %vm390_vm0, %v1639_v45 }
  0x49   : > { %760 = vmatpush.bf16.msrb.mxu3 %v1252_v16 }
  0x55   : > { %1321 = vmatmul.msk.bf16.vlgmr.msrb.gmra.mxu0 %vm390_vm0, %v1639_v45 }
  0x56   : > { %1322 = vmatmul.msk.bf16.vlgmr.msrb.gmra.mxu1 %vm390_vm0, %v1639_v45  ;;  %1323 = vmatmul.msk.bf16.vlgmr.msrb.gmra.mxu2 %vm390_vm0, %v1639_v45 }
  0x58   : > { %1324 = vmatmul.msk.bf16.vlgmr.msrb.gmra.mxu3 %vm390_vm0, %v1639_v45 }
  0xa2   : > { %v1673_v18 = vpop.f32.mrf.mxu0 }
  0xa3   : > { %v1675_v19 = vpop.f32.mrf.mxu1  ;;  %v499_v21 = vsel %vm498_vm1, %v1673_v18, 0.0 }
  0xa4   : > { %v500_v22 = vsel %vm498_vm1, %v1675_v19, 0.0 }
  0xa5   : > { %v501_v26 = vadd.f32 %v500_v22, %v499_v21 }
  0xa9   : > { %v1677_v20 = vpop.f32.mrf.mxu2 }
  0xaa   : > { %v405_v24 = vpop.f32.mrf.mxu0  ;;  %v502_v45 = vsel %vm498_vm1, %v1677_v20, 0.0 }
  0xab   : > { %v1683_v23 = vpop.f32.mrf.mxu3  ;;  %v418_v25 = vpop.f32.mrf.mxu1  ;;  %v503_v27 = vadd.f32 %v502_v45, %v501_v26 }
  0xac   : > { %v504_v28 = vsel %vm498_vm1, %v1683_v23, 0.0 }
  0xad   : > { %v505_v32 = vadd.f32 %v504_v28, %v503_v27 }
  0xb1   : > { %v431_v29 = vpop.f32.mrf.mxu2 }
  0xb2   : > { %v1689_v31 = vpop.f32.mrf.mxu0 }
  0xb3   : > { %v444_v30 = vpop.f32.mrf.mxu3  ;;  %v506_v33 = vsel %vm498_vm1, %v1689_v31, 0.0  ;;  %v1693_v34 = vpop.f32.mrf.mxu1 }
  0xb4   : > { %v507_v35 = vadd.f32 %v506_v33, %v505_v32  ;;  %v508_v36 = vsel %vm498_vm1, %v1693_v34, 0.0 }
  0xb6   : > { %v509_v38 = vadd.f32 %v508_v36, %v507_v35 }
  0xb9   : > { %v1697_v37 = vpop.f32.mrf.mxu2 }
  0xba   : > { %v457_v40 = vpop.f32.mrf.mxu0  ;;  %v510_v41 = vsel %vm498_vm1, %v1697_v37, 0.0 }
  0xbb   : > { %v1699_v39 = vpop.f32.mrf.mxu3  ;;  %v470_v42 = vpop.f32.mrf.mxu1  ;;  %v511_v43 = vadd.f32 %v510_v41, %v509_v38 }
  0xbc   : > { %v512_v44 = vsel %vm498_vm1, %v1699_v39, 0.0 }
  0xbd   : > { %v513_v46 = vadd.f32 %v512_v44, %v511_v43 }
  0xbf   : > { %514 = vadd.xlane.f32.xlu0 %v513_v46 }
  0xc1   : > { %v483_v47 = vpop.f32.mrf.mxu2 }
  0xc2   : > { %v1705_v49 = vpop.f32.mrf.mxu0 }
  0xc3   : > { %v496_v48 = vpop.f32.mrf.mxu3  ;;  %v1707_v50 = vpop.f32.mrf.mxu1  ;;  %v766_v52 = vsel %vm498_vm1, %v1705_v49, 0.0 }
  0xc4   : > { %v767_v53 = vsel %vm498_vm1, %v1707_v50, 0.0 }
  0xc5   : > { %v768_v58 = vadd.f32 %v767_v53, %v766_v52 }
  0xc9   : > { %v1709_v51 = vpop.f32.mrf.mxu2 }
  0xca   : > { %v673_v55 = vpop.f32.mrf.mxu0  ;;  %v769_v57 = vsel %vm498_vm1, %v1709_v51, 0.0 }
  0xcb   : > { %v1715_v54 = vpop.f32.mrf.mxu3  ;;  %v686_v56 = vpop.f32.mrf.mxu1  ;;  %v770_v59 = vadd.f32 %v769_v57, %v768_v58 }
  0xcc   : > { %v771_v60 = vsel %vm498_vm1, %v1715_v54, 0.0 }
  0xcd   : > { %v772_v0 = vadd.f32 %v771_v60, %v770_v59 }
  0xd1   : > { %v699_v61 = vpop.f32.mrf.mxu2 }
  0xd2   : > { %v1721_v63 = vpop.f32.mrf.mxu0 }
  0xd3   : > { %v712_v62 = vpop.f32.mrf.mxu3  ;;  %v773_v1 = vsel %vm498_vm1, %v1721_v63, 0.0  ;;  %v1725_v2 = vpop.f32.mrf.mxu1 }
  0xd4   : > { %v774_v3 = vadd.f32 %v773_v1, %v772_v0  ;;  %v775_v4 = vsel %vm498_vm1, %v1725_v2, 0.0 }
  0xd6   : > { %v776_v5 = vadd.f32 %v775_v4, %v774_v3 }
  0xd9   : > { %v1729_v6 = vpop.f32.mrf.mxu2 }
  0xda   : > { %v777_v7 = vsel %vm498_vm1, %v1729_v6, 0.0  ;;  %v725_v9 = vpop.f32.mrf.mxu0 }
  0xdb   : > { %v1733_v8 = vpop.f32.mrf.mxu3  ;;  %v738_v10 = vpop.f32.mrf.mxu1  ;;  %v778_v11 = vadd.f32 %v777_v7, %v776_v5 }
  0xdc   : > { %v779_v12 = vsel %vm498_vm1, %v1733_v8, 0.0 }
  0xdd   : > { %v780_v13 = vadd.f32 %v779_v12, %v778_v11 }
  0xdf   : > { %781 = vadd.xlane.f32.xlu0 %v780_v13 }
  0xe1   : > { %v751_v14 = vpop.f32.mrf.mxu2 }
  0xe3   : > { %v764_v15 = vpop.f32.mrf.mxu3 }
 0x132   : > { %v515_v16 = vpop.xlane.xlu0 %514 }
 0x152   : > { %v782_v17 = vpop.xlane.xlu0 %781 }
 0x153   : > { %v783_v21 = vadd.f32 %v782_v17, %v515_v16 }
 0x155   : > { %v1737_v22 = vmul.f32 0.00048828125, %v783_v21 }
 0x157   : > { %v785_v24 = vsub.f32 %v1673_v18, %v1737_v22  ;;  %v786_v25 = vsub.f32 %v1675_v19, %v1737_v22  ;;  %v787_v45 = vsub.f32 %v1677_v20, %v1737_v22  ;;  %v788_v26 = vsub.f32 %v1683_v23, %v1737_v22 }
 0x158   : > { %v789_v27 = vsub.f32 %v1689_v31, %v1737_v22  ;;  %v790_v32 = vsub.f32 %v1693_v34, %v1737_v22  ;;  %v791_v38 = vsub.f32 %v1697_v37, %v1737_v22  ;;  %v819_v43 = vsub.f32 %v1705_v49, %v1737_v22 }
 0x159   : > { %v793_v28 = vmul.f32 %v785_v24, %v785_v24  ;;  %v794_v29 = vmul.f32 %v786_v25, %v786_v25  ;;  %v795_v30 = vmul.f32 %v787_v45, %v787_v45  ;;  %v796_v33 = vmul.f32 %v788_v26, %v788_v26 }
 0x15a   : > { %v797_v40 = vmul.f32 %v789_v27, %v789_v27  ;;  %v820_v44 = vsub.f32 %v1707_v50, %v1737_v22  ;;  %v821_v46 = vsub.f32 %v1709_v51, %v1737_v22  ;;  %v792_v47 = vsub.f32 %v1699_v39, %v1737_v22 }
 0x15b   : > { %v801_v35 = vsel %vm498_vm1, %v793_v28, 0.0  ;;  %v802_v36 = vsel %vm498_vm1, %v794_v29, 0.0  ;;  %v804_v42 = vsel %vm498_vm1, %v795_v30, 0.0  ;;  %v822_v52 = vsub.f32 %v1715_v54, %v1737_v22 }
 0x15c   : > { %v803_v41 = vadd.f32 %v802_v36, %v801_v35  ;;  %v798_v53 = vmul.f32 %v790_v32, %v790_v32  ;;  %v806_v55 = vsel %vm498_vm1, %v796_v33, 0.0  ;;  %v827_v56 = vmul.f32 %v819_v43, %v819_v43 }
 0x15d   : > { %v828_v57 = vmul.f32 %v820_v44, %v820_v44  ;;  %v823_v59 = vsub.f32 %v1721_v63, %v1737_v22  ;;  %v829_v60 = vmul.f32 %v821_v46, %v821_v46  ;;  %v799_v61 = vmul.f32 %v791_v38, %v791_v38 }
 0x15e   : > { %v805_v48 = vadd.f32 %v804_v42, %v803_v41  ;;  %v808_v62 = vsel %vm498_vm1, %v797_v40, 0.0  ;;  %v835_v0 = vsel %vm498_vm1, %v827_v56, 0.0  ;;  %v824_v3 = vsub.f32 %v1725_v2, %v1737_v22 }
 0x15f   : > { %v830_v4 = vmul.f32 %v822_v52, %v822_v52  ;;  %v836_v5 = vsel %vm498_vm1, %v828_v57, 0.0  ;;  %v800_v7 = vmul.f32 %v792_v47, %v792_v47  ;;  %v810_v9 = vsel %vm498_vm1, %v798_v53, 0.0 }
 0x160   : > { %v807_v58 = vadd.f32 %v806_v55, %v805_v48  ;;  %v837_v10 = vadd.f32 %v836_v5, %v835_v0  ;;  %v825_v12 = vsub.f32 %v1729_v6, %v1737_v22  ;;  %v831_v13 = vmul.f32 %v823_v59, %v823_v59  ;;  %v867_v0 = vld [vmem:[%s243_s27] sm:$0xf] }
 0x161   : > { %v838_v14 = vsel %vm498_vm1, %v829_v60, 0.0  ;;  %v812_v15 = vsel %vm498_vm1, %v799_v61, 0.0  ;;  %v832_v21 = vmul.f32 %v824_v3, %v824_v3  ;;  %v840_v24 = vsel %vm498_vm1, %v830_v4, 0.0 }
 0x162   : > { %v809_v1 = vadd.f32 %v808_v62, %v807_v58  ;;  %v839_v16 = vadd.f32 %v838_v14, %v837_v10  ;;  %v814_v25 = vsel %vm498_vm1, %v800_v7, 0.0  ;;  %v826_v45 = vsub.f32 %v1733_v8, %v1737_v22  ;;  %v854_v58 = vld [vmem:[%s239_s20] sm:$0xf]  ;;  %s1493_s20 = scalar_lea.hbm %s1889_s4, 128 }
 0x163   : > { %v833_v28 = vmul.f32 %v825_v12, %v825_v12  ;;  %v842_v29 = vsel %vm498_vm1, %v831_v13, 0.0  ;;  %v844_v32 = vsel %vm498_vm1, %v832_v21, 0.0  ;;  %v1544_v42 = vmov 0   ;;  %p1495_p4 = scmp.lt.s32.totalorder %s1493_s20, %s1489_s12 }
 0x164   : > { %v811_v11 = vadd.f32 %v810_v9, %v809_v1  ;;  %v841_v26 = vadd.f32 %v840_v24, %v839_v16  ;;  %v834_v33 = vmul.f32 %v826_v45, %v826_v45  ;;  %1439 = vset.pattern.permute.xlu2 %v1544_v42  ;;  %1440 = vset.pattern.permute.xlu0 %v1544_v42 }
 0x165   : > { %v846_v36 = vsel %vm498_vm1, %v833_v28, 0.0  ;;  %p1496_p7 = por %p1495_p4, %p1494_p3 }
 0x166   : > { %v813_v17 = vadd.f32 %v812_v15, %v811_v11  ;;  %v843_v30 = vadd.f32 %v842_v29, %v841_v26  ;;  %v848_v40 = vsel %vm498_vm1, %v834_v33, 0.0 }
 0x167   : > { %p1497_p8 = pnand %p1496_p7, %p1492_p2 }
 0x168   : > { %v815_v27 = vadd.f32 %v814_v25, %v813_v17  ;;  %v845_v35 = vadd.f32 %v844_v32, %v843_v30 }
 0x16a   : > { %816 = vadd.xlane.f32.xlu1 %v815_v27  ;;  %v847_v38 = vadd.f32 %v846_v36, %v845_v35 }
 0x16c   : > { %v849_v41 = vadd.f32 %v848_v40, %v847_v38 }
 0x172   : > { %850 = vadd.xlane.f32.xlu1 %v849_v41 }
 0x1dd   : > { %v817_v43 = vpop.xlane.xlu1 %816 }
 0x1e5   : > { %v851_v44 = vpop.xlane.xlu1 %850 }
 0x1e6   : > { %v852_v46 = vadd.f32 %v851_v44, %v817_v43 }
 0x1e8   : > { %v853_v47 = vmul.f32 0.00048828125, %v852_v46 }
 0x1ea   : > { %v855_v48 = vadd.f32 1e-05, %v853_v47 }
 0x1ec   : > { %1441 = vrsqrt.f32 %v855_v48  ;;  %vm862_vm3 = vweird.f32 %v855_v48 }
 0x1f2   : > { %v1442_v52 = vpop.eup %1441 }
 0x1f3   : > { %v857_v53 = vmul.f32 %v1442_v52, %v855_v48  ;;  %vm863_vm2 = vweird.f32 %v1442_v52 }
 0x1f4   : > { %vm864_vm4 = vmor %vm862_vm3, %vm863_vm2 }
 0x1f5   : > { %v858_v55 = vmul.f32 %v1442_v52, %v857_v53 }
 0x1f7   : > { %v859_v56 = vmul.f32 0.5, %v858_v55 }
 0x1f9   : > { %v860_v57 = vsub.f32 1.5, %v859_v56 }
 0x1fb   : > { %v861_v59 = vmul.f32 %v1442_v52, %v860_v57 }
 0x1fd   : > { %v865_v60 = vsel %vm864_vm4, %v1442_v52, %v861_v59 }
 0x1fe   : > { %v866_v61 = vmul.f32 %v865_v60, %v854_v58 }
 0x200   : > { %872 = vperm.xlu2 %1439, %v866_v61   ;;  %v868_v62 = vmul.f32 %v866_v61, %v1737_v22 }
 0x202   : > { %v869_v1 = vsub.f32 %v867_v0, %v868_v62 }
 0x208   : > { %885 = vperm.xlu2 %1439, %v869_v1  }
 0x25a   : > { %v873_v3 = vpop.permute.xlu2 %872 }
 0x25b   : > { %v875_v4 = vmul.f32 %v873_v3, %v1673_v18  ;;  %v876_v5 = vmul.f32 %v873_v3, %v1675_v19  ;;  %v877_v7 = vmul.f32 %v873_v3, %v1677_v20  ;;  %v878_v9 = vmul.f32 %v873_v3, %v1683_v23 }
 0x25c   : > { %v879_v10 = vmul.f32 %v873_v3, %v1689_v31  ;;  %v880_v11 = vmul.f32 %v873_v3, %v1693_v34  ;;  %v881_v12 = vmul.f32 %v873_v3, %v1697_v37  ;;  %v882_v22 = vmul.f32 %v873_v3, %v1699_v39 }
 0x25d   : > { %v936_v13 = vmul.f32 %v873_v3, %v1705_v49  ;;  %v937_v14 = vmul.f32 %v873_v3, %v1707_v50  ;;  %v938_v18 = vmul.f32 %v873_v3, %v1709_v51  ;;  %v939_v19 = vmul.f32 %v873_v3, %v1715_v54 }
 0x25e   : > { %v940_v20 = vmul.f32 %v873_v3, %v1721_v63  ;;  %v941_v23 = vmul.f32 %v873_v3, %v1725_v2  ;;  %v942_v37 = vmul.f32 %v873_v3, %v1729_v6  ;;  %v943_v50 = vmul.f32 %v873_v3, %v1733_v8 }
 0x262   : > { %v886_v15 = vpop.permute.xlu2 %885 }
 0x263   : > { %v888_v31 = vadd.f32 %v886_v15, %v875_v4  ;;  %v889_v34 = vadd.f32 %v886_v15, %v876_v5  ;;  %v890_v16 = vadd.f32 %v886_v15, %v877_v7  ;;  %v891_v39 = vadd.f32 %v886_v15, %v878_v9 }
 0x264   : > { %v892_v49 = vadd.f32 %v886_v15, %v879_v10  ;;  %v893_v17 = vadd.f32 %v886_v15, %v880_v11  ;;  %v894_v51 = vadd.f32 %v886_v15, %v881_v12  ;;  %v895_v21 = vadd.f32 %v886_v15, %v882_v22 }
 0x265   : > { %v1813_v54 = vadd.f32 %v936_v13, %v886_v15  ;;  %v945_v63 = vadd.f32 %v937_v14, %v886_v15  ;;  %v1815_v24 = vadd.f32 %v938_v18, %v886_v15  ;;  %v947_v2 = vadd.f32 %v939_v19, %v886_v15 }
 0x266   : > { %v1817_v25 = vadd.f32 %v940_v20, %v886_v15  ;;  %v949_v45 = vadd.f32 %v941_v23, %v886_v15  ;;  %v896_v6 = vmul.f32 0.01, %v888_v31  ;;  %v897_v26 = vmul.f32 0.01, %v889_v34 }
 0x267   : > { %v898_v27 = vmul.f32 0.01, %v890_v16  ;;  %v950_v28 = vadd.f32 %v942_v37, %v886_v15  ;;  %v899_v8 = vmul.f32 0.01, %v891_v39  ;;  %v900_v29 = vmul.f32 0.01, %v892_v49 }
 0x268   : > { %v901_v30 = vmul.f32 0.01, %v893_v17  ;;  %v951_v32 = vadd.f32 %v943_v50, %v886_v15  ;;  %v902_v33 = vmul.f32 0.01, %v894_v51  ;;  %v903_v35 = vmul.f32 0.01, %v895_v21 }
 0x269   : > { %v905_v36 = vmax.f32 %v889_v34, %v897_v26  ;;  %v904_v38 = vmax.f32 %v888_v31, %v896_v6  ;;  %v906_v40 = vmax.f32 %v890_v16, %v898_v27  ;;  %v907_v41 = vmax.f32 %v891_v39, %v899_v8 }
 0x26a   : > { %v909_v42 = vmax.f32 %v893_v17, %v901_v30  ;;  %v908_v43 = vmax.f32 %v892_v49, %v900_v29  ;;  %v910_v44 = vmax.f32 %v894_v51, %v902_v33  ;;  %v911_v46 = vmax.f32 %v895_v21, %v903_v35 }
 0x26b   : > { %v920_v47 = vrot.slane %v905_v36, 4  ;;  %v921_v48 = vrot.slane %v907_v41, 4  ;;  %v952_v53 = vmul.f32 0.01, %v1813_v54  ;;  %v953_v55 = vmul.f32 0.01, %v945_v63 }
 0x26c   : > { %v922_v52 = vrot.slane %v909_v42, 4  ;;  %v923_v56 = vrot.slane %v911_v46, 4  ;;  %v954_v58 = vmul.f32 0.01, %v1815_v24  ;;  %v955_v59 = vmul.f32 0.01, %v947_v2 }
 0x26d   : > { %v924_v57 = vsel %vm498_vm1, %v904_v38, %v920_v47  ;;  %v925_v60 = vsel %vm498_vm1, %v906_v40, %v921_v48  ;;  %v956_v62 = vmul.f32 0.01, %v1817_v25  ;;  %v957_v0 = vmul.f32 0.01, %v949_v45 }
 0x26e   : > { %v926_v61 = vsel %vm498_vm1, %v908_v43, %v922_v52  ;;  %932 = vst [vmem:[%s1830_s5] sm:$0xff] %v924_v57  ;;  %v927_v1 = vsel %vm498_vm1, %v910_v44, %v923_v56  ;;  %v958_v3 = vmul.f32 0.01, %v950_v28  ;;  %v959_v4 = vmul.f32 0.01, %v951_v32 }
 0x26f   : > { %933 = vst [vmem:[%s1830_s5 + $0x8] sm:$0xff] %v925_v60  ;;  %v961_v5 = vmax.f32 %v945_v63, %v953_v55  ;;  %v963_v7 = vmax.f32 %v947_v2, %v955_v59  ;;  %v965_v9 = vmax.f32 %v949_v45, %v957_v0  ;;  %v960_v10 = vmax.f32 %v1813_v54, %v952_v53 }
 0x270   : > { %934 = vst [vmem:[%s1830_s5 + $0x10] sm:$0xff] %v926_v61  ;;  %v967_v11 = vmax.f32 %v951_v32, %v959_v4  ;;  %v962_v22 = vmax.f32 %v1815_v24, %v954_v58  ;;  %v964_v13 = vmax.f32 %v1817_v25, %v956_v62  ;;  %v966_v19 = vmax.f32 %v950_v28, %v958_v3 }
 0x271   : > { %935 = vst [vmem:[%s1830_s5 + $0x18] sm:$0xff] %v927_v1  ;;  %v976_v12 = vrot.slane %v961_v5, 4  ;;  %v977_v14 = vrot.slane %v963_v7, 4  ;;  %v978_v18 = vrot.slane %v965_v9, 4 }
 0x272   : > { %v979_v20 = vrot.slane %v967_v11, 4 }
 0x273   : > { %v980_v15 = vsel %vm498_vm1, %v960_v10, %v976_v12  ;;  %v981_v23 = vsel %vm498_vm1, %v962_v22, %v977_v14  ;;  %v982_v31 = vsel %vm498_vm1, %v964_v13, %v978_v18 }
 0x274   : > { %1325 = vst [vmem:[%s1830_s5 + $0x20] sm:$0xff] %v980_v15  ;;  %v983_v34 = vsel %vm498_vm1, %v966_v19, %v979_v20 }
 0x275   : > { %1326 = vst [vmem:[%s1830_s5 + $0x28] sm:$0xff] %v981_v23 }
 0x276   : > { %1327 = vst [vmem:[%s1830_s5 + $0x30] sm:$0xff] %v982_v31 }
 0x277   : > { %1328 = vst [vmem:[%s1830_s5 + $0x38] sm:$0xff] %v983_v34 }
 0x278   : > { %1500 = shalt.err (!%p1497_p8)
}
 0x279   : > { %s1545_s27 = smov 512   ;;  %s1546_s28 = smov 1024  }
 0x27a   : > { %s1547_s29 = smov 32  }
 0x27b   : > { %1387 = dma.vmem_to_hbm [thread:$0]  (%p1611_p5), %s1846_s8, 1024, %s1009_s9, %s994_s10, %s1545_s27, %s1546_s28, %s1547_s29  }
 0x27c PF: > { %p1399_p9 = scmp.ge.s32.totalorder %s1539_s18, 2  ;;  %s1023_s30 = sand.u32 1, %s1527_s15  }
 0x27d   : > { %s1024_s5 = scalar_lea.sflag [#allocation4], %s1023_s30 }
 0x27e   : > { %p1394_p10 = pnand %p1399_p9, %p1615_p6 }
 0x280   : > { %p1395_p11 = pneg %p1394_p10 }
 0x282   : > { %1522 = dma.done.wait (%p1395_p11), %s1024_s5, 1024  }
 0x283   : > { %1524 = vsyncadd (%p1395_p11), %s1024_s5, 4294966272  ;;  %p15_p12 = scmp.ge.s32.totalorder %s1598_s21, 4   ;;  %s1892_s15 = smov %s1531_s16 }
 0x284   : > { %s1893_s16 = smov %s1535_s17  ;;  %s1894_s17 = smov %s1609_s24 }
 0x285   : > { %s1895_s18 = smov %s1598_s21  ;;  %17 = sbr.rel (!%p15_p12) target bundleno = 4 (0x4), region = 84 }
 0x28a   :  { %1030 = vsyncpa [#allocation3], 1 }
 0x28b   :  { %1032 = vsyncpa [#allocation3 + $0x1], 1 }
 0x28c   :  { %1033 = vsyncpa [#allocation4], 1 }
 0x28d   :  { %1035 = vsyncpa [#allocation4 + $0x1], 1 }

</bundles_post_ra>
